<compile_context>
chip_gen: v7x
topology: tpu7x:2x2x1
jax: 0.10.0
libtpu: 0.0.40
codegen_flags: <defaults>
</compile_context>

<pallas_src>
import functools

import jax
import jax.numpy as jnp
from jax import lax
from jax.experimental import pallas as pl
from jax.experimental.pallas import tpu as pltpu


def _sigmoid(x):
    # sigmoid(x) == 0.5 * tanh(x/2) + 0.5 : one EUP op + 2 VALU ops (vs exp + divide).
    return 0.5 * jnp.tanh(0.5 * x) + 0.5


def _reorder_gate_axis(a, H):
    # PyTorch nn.LSTM packs gates as [i, f, g, o] along the 4H axis; reorder to [i, f, o, g]
    # so the kernel applies one contiguous sigmoid over 3H lanes and one tanh over H lanes.
    return jnp.concatenate([a[..., 0:2 * H], a[..., 3 * H:4 * H], a[..., 2 * H:3 * H]], axis=-1)


def _lstm_kernel(x_ref, wih0_ref, whh0_ref, wstk_ref, bias_ref, wfc_ref, bfc_ref,
                 out_ref, xg_ref, xh_ref, c_ref, *, num_layers, hidden_size, seq_len):
    """One grid step == one batch tile; the full time loop runs in-kernel."""
    H = hidden_size
    T = seq_len
    L = num_layers
    bt = x_ref.shape[1]
    D = x_ref.shape[2]
    cdt = wih0_ref.dtype                      # matmul operand dtype (bf16 or f32)

    # ---- Phase 1: hoisted layer-0 input projection for ALL timesteps (one big matmul) ----
    x_all = x_ref[...].reshape(T * bt, D)                              # (T*bt, D), compute dtype
    xg = jnp.dot(x_all, wih0_ref[...], preferred_element_type=jnp.float32)
    # bias0 folded in once; stored in the compute dtype (halves the dominant scratch)
    xg_ref[...] = (xg + bias_ref[0]).reshape(T, bt, 4 * H).astype(xg_ref.dtype)

    # ---- state init (fresh per batch tile) ----
    xh_ref[...] = jnp.zeros_like(xh_ref)      # per layer: [:, 0:H] = h_prev, [:, H:2H] = input
    c_ref[...] = jnp.zeros_like(c_ref)

    def cell_update(gates, layer):
        # gate layout (wrapper-reordered): [i | f | o | g]
        sg = _sigmoid(gates[:, 0:3 * H])      # one contiguous 3H-wide sigmoid
        i_g = sg[:, 0:H]
        f_g = sg[:, H:2 * H]
        o_g = sg[:, 2 * H:3 * H]
        g_g = jnp.tanh(gates[:, 3 * H:4 * H])
        c_new = f_g * c_ref[layer] + i_g * g_g
        h_new = o_g * jnp.tanh(c_new)
        c_ref[layer] = c_new
        if layer > 0 or L == 1:
            # layer 0's recurrent input is carried in vregs when L > 1; skip the store.
            xh_ref[layer, :, 0:H] = h_new                  # becomes h_prev at t+1
        if layer + 1 < L:
            xh_ref[layer + 1, :, H:2 * H] = h_new          # input of the layer above (this t)
        return h_new

    # ---- Phase 2: sequential recurrence over timesteps ----
    # rec0 carries h0(t-1) @ W_hh_l0 (f32), computed one step ahead so the serial
    # MXU->pop->EUP->VPU chain of layer 0 hides under the layer>=1 work of the same step.
    def step(t, rec0):
        g0 = xg_ref[t].astype(jnp.float32) + rec0
        h0 = cell_update(g0, 0)
        rec0_next = jnp.dot(h0.astype(cdt), whh0_ref[...],
                            preferred_element_type=jnp.float32)
        for l in range(1, L):
            g = (jnp.dot(xh_ref[l].astype(cdt), wstk_ref[l - 1],
                         preferred_element_type=jnp.float32)
                 + bias_ref[l])
            cell_update(g, l)
        return rec0_next

    lax.fori_loop(0, T, step, jnp.zeros((bt, 4 * H), jnp.float32))

    # ---- final Linear on the top layer's hidden state at the last timestep ----
    h_top = xh_ref[L - 1, :, 0:H].astype(cdt)
    out_ref[...] = (jnp.dot(h_top, wfc_ref[...], preferred_element_type=jnp.float32)
                    + bfc_ref[...]).astype(out_ref.dtype)


def lstm_regressor_forward(x, params, *, hidden_size, num_layers, output_size,
                           compute_dtype=jnp.bfloat16, batch_tile=None):
    """x: (B, T, input_size) float32 (PyTorch batch_first). Returns (B, output_size) f32."""
    B, T, input_size = x.shape
    H = hidden_size
    L = num_layers
    O = output_size
    cdt = jnp.dtype(compute_dtype)
    csz = cdt.itemsize
    sub = 16 if csz == 2 else 8                # sublane multiple for the compute dtype

    # ---- generation-aware hardware query (trace-time) ----
    try:
        vmem_cap = int(pltpu.get_tpu_info().vmem_capacity_bytes)
        cap_known = True
    except Exception:
        vmem_cap, cap_known = 64 << 20, False  # conservative fallback (v7x per-TC size)

    # ---- batch tiling: single tile on v5e/v6e (1 TC), 2-4 tiles on v7x (2 TCs) ----
    if batch_tile is None:
        bt = B
        if cap_known and vmem_cap <= (64 << 20):
            if B % 4 == 0 and (B // 4) % sub == 0 and (B // 4) >= 256:
                bt = B // 4        # 2 tiles per core: next tile's x DMA hides under recurrence
            elif B % 2 == 0 and (B // 2) % sub == 0:
                bt = B // 2
    else:
        bt = batch_tile
    assert B % bt == 0 and (bt == B or bt % sub == 0), \
        f"batch tile must divide B and be a multiple of {sub} (or equal B)"
    nbt = B // bt

    # ---- glue: layout + weight packing (plain JAX, gate order -> [i, f, o, g]) ----
    x_tm = jnp.transpose(x, (1, 0, 2)).astype(cdt)                 # time-major (T, B, D), 1 pass

    wih0_t = _reorder_gate_axis(params["weight_ih_l0"].T, H).astype(cdt)     # (D, 4H)
    whh0_t = _reorder_gate_axis(params["weight_hh_l0"].T, H).astype(cdt)     # (H, 4H)
    if L > 1:
        # rows 0:H multiply h_prev, rows H:2H multiply the input from the layer below
        wstk = jnp.stack([
            _reorder_gate_axis(
                jnp.concatenate([params[f"weight_hh_l{l}"].T,
                                 params[f"weight_ih_l{l}"].T], axis=0), H)
            for l in range(1, L)]).astype(cdt)                     # (L-1, 2H, 4H)
    else:
        wstk = jnp.zeros((1, 1, 1), cdt)                           # placeholder, never read

    bias = jnp.stack([
        _reorder_gate_axis(params[f"bias_ih_l{l}"] + params[f"bias_hh_l{l}"], H)[None, :]
        for l in range(L)]).astype(jnp.float32)                    # (L, 1, 4H), kept f32
    wfc_t = params["fc_weight"].T.astype(cdt)                      # (H, O)
    bfc = params["fc_bias"][None, :].astype(jnp.float32)           # (1, O)

    # ---- VMEM limit: computed from the actual footprint, clamped per-generation ----
    wstk_elems = (L - 1) * 2 * H * 4 * H if L > 1 else 1
    w_bytes = (input_size * 4 * H + H * 4 * H + wstk_elems + H * O) * csz + (L * 4 * H + O) * 4
    x_bytes = 2 * T * bt * input_size * csz                        # x is double-buffered
    scr_bytes = (T * bt * 4 * H * csz                              # xg (compute dtype)
                 + L * bt * 2 * H * 4 + L * bt * H * 4             # xh, c (f32)
                 + bt * 4 * H * 4)                                 # rec0 carry spill headroom
    out_bytes = 2 * bt * O * 4
    footprint = w_bytes + x_bytes + scr_bytes + out_bytes
    hi = int(0.70 * vmem_cap)
    vmem_limit = int(max(min(2 * footprint + (8 << 20), hi), min(32 << 20, hi)))

    kernel = functools.partial(_lstm_kernel, num_layers=L, hidden_size=H, seq_len=T)
    const = pl.Buffered(1)       # weights/biases never change across grid steps

    out = pl.pallas_call(
        kernel,
        out_shape=jax.ShapeDtypeStruct((B, O), jnp.float32),
        grid_spec=pltpu.PrefetchScalarGridSpec(
            num_scalar_prefetch=0,
            grid=(nbt,),                                           # batch tiles only
            in_specs=[
                pl.BlockSpec((T, bt, input_size), lambda b: (0, b, 0)),      # x (double-buffered)
                pl.BlockSpec((input_size, 4 * H), lambda b: (0, 0),
                             pipeline_mode=const),                           # W_ih_l0^T
                pl.BlockSpec((H, 4 * H), lambda b: (0, 0),
                             pipeline_mode=const),                           # W_hh_l0^T
                pl.BlockSpec(wstk.shape, lambda b: (0, 0, 0),
                             pipeline_mode=const),                           # fused l>=1 weights
                pl.BlockSpec((L, 1, 4 * H), lambda b: (0, 0, 0),
                             pipeline_mode=const),                           # biases
                pl.BlockSpec((H, O), lambda b: (0, 0),
                             pipeline_mode=const),                           # fc weight^T
                pl.BlockSpec((1, O), lambda b: (0, 0),
                             pipeline_mode=const),                           # fc bias
            ],
            out_specs=pl.BlockSpec((bt, O), lambda b: (b, 0)),
            scratch_shapes=[
                pltpu.VMEM((T, bt, 4 * H), cdt),           # hoisted layer-0 gate inputs
                pltpu.VMEM((L, bt, 2 * H), jnp.float32),   # [h_prev | input] per layer
                pltpu.VMEM((L, bt, H), jnp.float32),       # cell state
            ],
        ),
        compiler_params=pltpu.CompilerParams(
            dimension_semantics=("parallel",),             # batch tiles -> both TCs on v7x
            vmem_limit_bytes=vmem_limit),
    )(x_tm, wih0_t, whh0_t, wstk, bias, wfc_t, bfc)
    return out


# ---- pure-JAX reference (mirrors torch.nn.LSTM eval forward) ----
def lstm_regressor_ref(x, params, *, hidden_size, num_layers, output_size):
    B, T, _ = x.shape
    H = hidden_size
    layer_in = x
    for l in range(num_layers):
        w_ih = params[f"weight_ih_l{l}"]
        w_hh = params[f"weight_hh_l{l}"]
        b = params[f"bias_ih_l{l}"] + params[f"bias_hh_l{l}"]
        h = jnp.zeros((B, H), jnp.float32)
        c = jnp.zeros((B, H), jnp.float32)
        outs = []
        for t in range(T):
            g = layer_in[:, t, :] @ w_ih.T + h @ w_hh.T + b
            i = jax.nn.sigmoid(g[:, 0 * H:1 * H])
            f = jax.nn.sigmoid(g[:, 1 * H:2 * H])
            gg = jnp.tanh(g[:, 2 * H:3 * H])
            o = jax.nn.sigmoid(g[:, 3 * H:4 * H])
            c = f * c + i * gg
            h = o * jnp.tanh(c)
            outs.append(h)
        layer_in = jnp.stack(outs, axis=1)
    return layer_in[:, -1, :] @ params["fc_weight"].T + params["fc_bias"]


def init_params(key, input_size, hidden_size, num_layers, output_size):
    H = hidden_size
    k = 1.0 / jnp.sqrt(jnp.float32(H))
    params = {}
    for l in range(num_layers):
        in_l = input_size if l == 0 else H
        for name, shape in [(f"weight_ih_l{l}", (4 * H, in_l)),
                            (f"weight_hh_l{l}", (4 * H, H)),
                            (f"bias_ih_l{l}", (4 * H,)),
                            (f"bias_hh_l{l}", (4 * H,))]:
            key, sub = jax.random.split(key)
            params[name] = jax.random.uniform(sub, shape, jnp.float32, -k, k)
    key, sub = jax.random.split(key)
    params["fc_weight"] = jax.random.uniform(sub, (output_size, H), jnp.float32, -k, k)
    key, sub = jax.random.split(key)
    params["fc_bias"] = jax.random.uniform(sub, (output_size,), jnp.float32, -k, k)
    return params


if __name__ == "__main__":
    batch = 8
    seq = 8
    input_size = 16
    hidden_size = 32
    num_layers = 2
    output_size = 4

    key = jax.random.PRNGKey(0)
    key, kx = jax.random.split(key)
    x = jax.random.normal(kx, (batch, seq, input_size), jnp.float32)
    params = init_params(key, input_size, hidden_size, num_layers, output_size)

    ref = lstm_regressor_ref(x, params, hidden_size=hidden_size,
                             num_layers=num_layers, output_size=output_size)

    # Exact-precision path (f32 matmul operands): tight semantics check.
    out_f32 = lstm_regressor_forward(x, params, hidden_size=hidden_size,
                                     num_layers=num_layers, output_size=output_size,
                                     compute_dtype=jnp.float32)
    out_f32 = jax.block_until_ready(out_f32)
    assert out_f32.shape == (batch, output_size)
    assert jnp.allclose(out_f32, ref, atol=1e-4, rtol=1e-4), \
        f"f32 max abs err {jnp.max(jnp.abs(out_f32 - ref))}"

    # Fast path (default): bf16 matmul operands, f32 accumulation and f32 c/h state.
    # NOTE: bf16 drift grows with T; re-validate tolerance at production sequence lengths.
    out_bf16 = lstm_regressor_forward(x, params, hidden_size=hidden_size,
                                      num_layers=num_layers, output_size=output_size)
    out_bf16 = jax.block_until_ready(out_bf16)
    assert out_bf16.shape == (batch, output_size)
    assert jnp.allclose(out_bf16, ref, atol=2e-2, rtol=2e-2), \
        f"bf16 max abs err {jnp.max(jnp.abs(out_bf16 - ref))}"

    print("KERNEL_OK")
</pallas_src>

<mosaic_0001>
module attributes {stable_mosaic.version = 11 : i64} {
  func.func @_lstm_kernel(%arg0: i32, %arg1: memref<8x8x16xf32, #tpu.memory_space<vmem>>, %arg2: memref<16x128xf32, #tpu.memory_space<vmem>>, %arg3: memref<32x128xf32, #tpu.memory_space<vmem>>, %arg4: memref<1x64x128xf32, #tpu.memory_space<vmem>>, %arg5: memref<2x1x128xf32, #tpu.memory_space<vmem>>, %arg6: memref<32x4xf32, #tpu.memory_space<vmem>>, %arg7: memref<1x4xf32, #tpu.memory_space<vmem>>, %arg8: memref<8x4xf32, #tpu.memory_space<vmem>>, %arg9: memref<8x8x128xf32, #tpu.memory_space<vmem>>, %arg10: memref<2x8x64xf32, #tpu.memory_space<vmem>>, %arg11: memref<2x8x32xf32, #tpu.memory_space<vmem>>) attributes {dimension_semantics = [#tpu.dimension_semantics<parallel>], iteration_bounds = array<i64: 1>, scalar_prefetch = 0 : i64, scratch_operands = 3 : i64, tpu.core_type = #tpu.core_type<tc>, window_params = [{transform_indices = @transform_0, window_bounds = array<i64: 8, 8, 16>}, {pipeline_mode = #tpu.pipeline_mode<synchronous>, transform_indices = @transform_1, window_bounds = array<i64: 16, 128>}, {pipeline_mode = #tpu.pipeline_mode<synchronous>, transform_indices = @transform_2, window_bounds = array<i64: 32, 128>}, {pipeline_mode = #tpu.pipeline_mode<synchronous>, transform_indices = @transform_3, window_bounds = array<i64: 1, 64, 128>}, {pipeline_mode = #tpu.pipeline_mode<synchronous>, transform_indices = @transform_4, window_bounds = array<i64: 2, 1, 128>}, {pipeline_mode = #tpu.pipeline_mode<synchronous>, transform_indices = @transform_5, window_bounds = array<i64: 32, 4>}, {pipeline_mode = #tpu.pipeline_mode<synchronous>, transform_indices = @transform_6, window_bounds = array<i64: 1, 4>}, {transform_indices = @transform_7, window_bounds = array<i64: 8, 4>}]} {
    %c0 = arith.constant 0 : index
    %c0_0 = arith.constant 0 : index
    %c0_1 = arith.constant 0 : index
    %0 = vector.load %arg1[%c0, %c0_0, %c0_1] : memref<8x8x16xf32, #tpu.memory_space<vmem>>, vector<8x8x16xf32>
    %1 = vector.shape_cast %0 : vector<8x8x16xf32> to vector<64x16xf32>
    %c0_2 = arith.constant 0 : index
    %c0_3 = arith.constant 0 : index
    %2 = vector.load %arg2[%c0_2, %c0_3] : memref<16x128xf32, #tpu.memory_space<vmem>>, vector<16x128xf32>
    %cst = arith.constant dense<0.000000e+00> : vector<64x128xf32>
    %3 = tpu.matmul %1, %2, %cst {dimension_numbers = #tpu.dot_dimension_numbers<[1], [0], [0], [1], [0, 0, 1, 1], [], []>} : vector<64x16xf32>, vector<16x128xf32>, vector<64x128xf32> -> vector<64x128xf32>
    %c0_4 = arith.constant 0 : index
    %c0_5 = arith.constant 0 : index
    %c0_6 = arith.constant 0 : index
    %4 = vector.load %arg5[%c0_4, %c0_5, %c0_6] : memref<2x1x128xf32, #tpu.memory_space<vmem>>, vector<1x1x128xf32>
    %5 = vector.shape_cast %4 : vector<1x1x128xf32> to vector<1x128xf32>
    %6 = vector.broadcast %5 : vector<1x128xf32> to vector<64x128xf32>
    %7 = arith.addf %3, %6 : vector<64x128xf32>
    %8 = vector.shape_cast %7 : vector<64x128xf32> to vector<8x8x128xf32>
    %c0_7 = arith.constant 0 : index
    %c0_8 = arith.constant 0 : index
    %c0_9 = arith.constant 0 : index
    %9 = vector.load %arg9[%c0_7, %c0_8, %c0_9] : memref<8x8x128xf32, #tpu.memory_space<vmem>>, vector<8x8x128xf32>
    tpu.vector_store %arg9[%c0_7, %c0_8, %c0_9], %8 {strides = array<i32>} : memref<8x8x128xf32, #tpu.memory_space<vmem>>, vector<8x8x128xf32>,
    %cst_10 = arith.constant 0.000000e+00 : f32
    %10 = vector.broadcast %cst_10 : f32 to vector<2x8x64xf32>
    %c0_11 = arith.constant 0 : index
    %c0_12 = arith.constant 0 : index
    %c0_13 = arith.constant 0 : index
    %11 = vector.load %arg10[%c0_11, %c0_12, %c0_13] : memref<2x8x64xf32, #tpu.memory_space<vmem>>, vector<2x8x64xf32>
    tpu.vector_store %arg10[%c0_11, %c0_12, %c0_13], %10 {strides = array<i32>} : memref<2x8x64xf32, #tpu.memory_space<vmem>>, vector<2x8x64xf32>,
    %cst_14 = arith.constant 0.000000e+00 : f32
    %12 = vector.broadcast %cst_14 : f32 to vector<2x8x32xf32>
    %c0_15 = arith.constant 0 : index
    %c0_16 = arith.constant 0 : index
    %c0_17 = arith.constant 0 : index
    %13 = vector.load %arg11[%c0_15, %c0_16, %c0_17] : memref<2x8x32xf32, #tpu.memory_space<vmem>>, vector<2x8x32xf32>
    tpu.vector_store %arg11[%c0_15, %c0_16, %c0_17], %12 {strides = array<i32>} : memref<2x8x32xf32, #tpu.memory_space<vmem>>, vector<2x8x32xf32>,
    %cst_18 = arith.constant 0.000000e+00 : f32
    %14 = vector.broadcast %cst_18 : f32 to vector<8x128xf32>
    %c0_i32 = arith.constant 0 : i32
    %c8_i32 = arith.constant 8 : i32
    %15 = arith.addi %c0_i32, %c8_i32 : i32
    %c1_i32 = arith.constant 1 : i32
    %16 = scf.for %arg12 = %c0_i32 to %15 step %c1_i32 iter_args(%arg13 = %14) -> (vector<8x128xf32>)  : i32 {
      %25 = arith.index_cast %arg12 : i32 to index
      %c0_29 = arith.constant 0 : index
      %c0_30 = arith.constant 0 : index
      %26 = vector.load %arg9[%25, %c0_29, %c0_30] : memref<8x8x128xf32, #tpu.memory_space<vmem>>, vector<1x8x128xf32>
      %27 = vector.shape_cast %26 : vector<1x8x128xf32> to vector<8x128xf32>
      %28 = arith.addf %27, %arg13 : vector<8x128xf32>
      %29 = vector.extract_strided_slice %28 {offsets = [0, 0], sizes = [8, 96], strides = [1, 1]} : vector<8x128xf32> to vector<8x96xf32>
      %cst_31 = arith.constant 5.000000e-01 : f32
      %30 = vector.broadcast %cst_31 : f32 to vector<8x96xf32>
      %31 = arith.mulf %30, %29 : vector<8x96xf32>
      %32 = math.tanh %31 : vector<8x96xf32>
      %cst_32 = arith.constant 5.000000e-01 : f32
      %33 = vector.broadcast %cst_32 : f32 to vector<8x96xf32>
      %34 = arith.mulf %33, %32 : vector<8x96xf32>
      %cst_33 = arith.constant 5.000000e-01 : f32
      %35 = vector.broadcast %cst_33 : f32 to vector<8x96xf32>
      %36 = arith.addf %34, %35 : vector<8x96xf32>
      %37 = vector.extract_strided_slice %36 {offsets = [0, 0], sizes = [8, 32], strides = [1, 1]} : vector<8x96xf32> to vector<8x32xf32>
      %38 = vector.extract_strided_slice %36 {offsets = [0, 32], sizes = [8, 32], strides = [1, 1]} : vector<8x96xf32> to vector<8x32xf32>
      %39 = vector.extract_strided_slice %36 {offsets = [0, 64], sizes = [8, 32], strides = [1, 1]} : vector<8x96xf32> to vector<8x32xf32>
      %40 = vector.extract_strided_slice %28 {offsets = [0, 96], sizes = [8, 32], strides = [1, 1]} : vector<8x128xf32> to vector<8x32xf32>
      %41 = math.tanh %40 : vector<8x32xf32>
      %c0_34 = arith.constant 0 : index
      %c0_35 = arith.constant 0 : index
      %c0_36 = arith.constant 0 : index
      %42 = vector.load %arg11[%c0_34, %c0_35, %c0_36] : memref<2x8x32xf32, #tpu.memory_space<vmem>>, vector<1x8x32xf32>
      %43 = vector.shape_cast %42 : vector<1x8x32xf32> to vector<8x32xf32>
      %44 = arith.mulf %38, %43 : vector<8x32xf32>
      %45 = arith.mulf %37, %41 : vector<8x32xf32>
      %46 = arith.addf %44, %45 : vector<8x32xf32>
      %47 = math.tanh %46 : vector<8x32xf32>
      %48 = arith.mulf %39, %47 : vector<8x32xf32>
      %c0_37 = arith.constant 0 : index
      %c0_38 = arith.constant 0 : index
      %c0_39 = arith.constant 0 : index
      %49 = vector.load %arg11[%c0_37, %c0_38, %c0_39] : memref<2x8x32xf32, #tpu.memory_space<vmem>>, vector<1x8x32xf32>
      %50 = vector.shape_cast %49 : vector<1x8x32xf32> to vector<8x32xf32>
      %51 = vector.shape_cast %46 : vector<8x32xf32> to vector<1x8x32xf32>
      tpu.vector_store %arg11[%c0_37, %c0_38, %c0_39], %51 {strides = array<i32>} : memref<2x8x32xf32, #tpu.memory_space<vmem>>, vector<1x8x32xf32>,
      %c1_40 = arith.constant 1 : index
      %c0_41 = arith.constant 0 : index
      %c32 = arith.constant 32 : index
      %52 = vector.load %arg10[%c1_40, %c0_41, %c32] : memref<2x8x64xf32, #tpu.memory_space<vmem>>, vector<1x8x32xf32>
      %53 = vector.shape_cast %52 : vector<1x8x32xf32> to vector<8x32xf32>
      %54 = vector.shape_cast %48 : vector<8x32xf32> to vector<1x8x32xf32>
      tpu.vector_store %arg10[%c1_40, %c0_41, %c32], %54 {strides = array<i32>} : memref<2x8x64xf32, #tpu.memory_space<vmem>>, vector<1x8x32xf32>,
      %c0_42 = arith.constant 0 : index
      %c0_43 = arith.constant 0 : index
      %55 = vector.load %arg3[%c0_42, %c0_43] : memref<32x128xf32, #tpu.memory_space<vmem>>, vector<32x128xf32>
      %cst_44 = arith.constant dense<0.000000e+00> : vector<8x128xf32>
      %56 = tpu.matmul %48, %55, %cst_44 {dimension_numbers = #tpu.dot_dimension_numbers<[1], [0], [0], [1], [0, 0, 1, 1], [], []>} : vector<8x32xf32>, vector<32x128xf32>, vector<8x128xf32> -> vector<8x128xf32>
      %c1_45 = arith.constant 1 : index
      %c0_46 = arith.constant 0 : index
      %c0_47 = arith.constant 0 : index
      %57 = vector.load %arg10[%c1_45, %c0_46, %c0_47] : memref<2x8x64xf32, #tpu.memory_space<vmem>>, vector<1x8x64xf32>
      %58 = vector.shape_cast %57 : vector<1x8x64xf32> to vector<8x64xf32>
      %c0_48 = arith.constant 0 : index
      %c0_49 = arith.constant 0 : index
      %c0_50 = arith.constant 0 : index
      %59 = vector.load %arg4[%c0_48, %c0_49, %c0_50] : memref<1x64x128xf32, #tpu.memory_space<vmem>>, vector<1x64x128xf32>
      %60 = vector.shape_cast %59 : vector<1x64x128xf32> to vector<64x128xf32>
      %cst_51 = arith.constant dense<0.000000e+00> : vector<8x128xf32>
      %61 = tpu.matmul %58, %60, %cst_51 {dimension_numbers = #tpu.dot_dimension_numbers<[1], [0], [0], [1], [0, 0, 1, 1], [], []>} : vector<8x64xf32>, vector<64x128xf32>, vector<8x128xf32> -> vector<8x128xf32>
      %c1_52 = arith.constant 1 : index
      %c0_53 = arith.constant 0 : index
      %c0_54 = arith.constant 0 : index
      %62 = vector.load %arg5[%c1_52, %c0_53, %c0_54] : memref<2x1x128xf32, #tpu.memory_space<vmem>>, vector<1x1x128xf32>
      %63 = vector.shape_cast %62 : vector<1x1x128xf32> to vector<1x128xf32>
      %64 = vector.broadcast %63 : vector<1x128xf32> to vector<8x128xf32>
      %65 = arith.addf %61, %64 : vector<8x128xf32>
      %66 = vector.extract_strided_slice %65 {offsets = [0, 0], sizes = [8, 96], strides = [1, 1]} : vector<8x128xf32> to vector<8x96xf32>
      %cst_55 = arith.constant 5.000000e-01 : f32
      %67 = vector.broadcast %cst_55 : f32 to vector<8x96xf32>
      %68 = arith.mulf %67, %66 : vector<8x96xf32>
      %69 = math.tanh %68 : vector<8x96xf32>
      %cst_56 = arith.constant 5.000000e-01 : f32
      %70 = vector.broadcast %cst_56 : f32 to vector<8x96xf32>
      %71 = arith.mulf %70, %69 : vector<8x96xf32>
      %cst_57 = arith.constant 5.000000e-01 : f32
      %72 = vector.broadcast %cst_57 : f32 to vector<8x96xf32>
      %73 = arith.addf %71, %72 : vector<8x96xf32>
      %74 = vector.extract_strided_slice %73 {offsets = [0, 0], sizes = [8, 32], strides = [1, 1]} : vector<8x96xf32> to vector<8x32xf32>
      %75 = vector.extract_strided_slice %73 {offsets = [0, 32], sizes = [8, 32], strides = [1, 1]} : vector<8x96xf32> to vector<8x32xf32>
      %76 = vector.extract_strided_slice %73 {offsets = [0, 64], sizes = [8, 32], strides = [1, 1]} : vector<8x96xf32> to vector<8x32xf32>
      %77 = vector.extract_strided_slice %65 {offsets = [0, 96], sizes = [8, 32], strides = [1, 1]} : vector<8x128xf32> to vector<8x32xf32>
      %78 = math.tanh %77 : vector<8x32xf32>
      %c1_58 = arith.constant 1 : index
      %c0_59 = arith.constant 0 : index
      %c0_60 = arith.constant 0 : index
      %79 = vector.load %arg11[%c1_58, %c0_59, %c0_60] : memref<2x8x32xf32, #tpu.memory_space<vmem>>, vector<1x8x32xf32>
      %80 = vector.shape_cast %79 : vector<1x8x32xf32> to vector<8x32xf32>
      %81 = arith.mulf %75, %80 : vector<8x32xf32>
      %82 = arith.mulf %74, %78 : vector<8x32xf32>
      %83 = arith.addf %81, %82 : vector<8x32xf32>
      %84 = math.tanh %83 : vector<8x32xf32>
      %85 = arith.mulf %76, %84 : vector<8x32xf32>
      %c1_61 = arith.constant 1 : index
      %c0_62 = arith.constant 0 : index
      %c0_63 = arith.constant 0 : index
      %86 = vector.load %arg11[%c1_61, %c0_62, %c0_63] : memref<2x8x32xf32, #tpu.memory_space<vmem>>, vector<1x8x32xf32>
      %87 = vector.shape_cast %86 : vector<1x8x32xf32> to vector<8x32xf32>
      %88 = vector.shape_cast %83 : vector<8x32xf32> to vector<1x8x32xf32>
      tpu.vector_store %arg11[%c1_61, %c0_62, %c0_63], %88 {strides = array<i32>} : memref<2x8x32xf32, #tpu.memory_space<vmem>>, vector<1x8x32xf32>,
      %c1_64 = arith.constant 1 : index
      %c0_65 = arith.constant 0 : index
      %c0_66 = arith.constant 0 : index
      %89 = vector.load %arg10[%c1_64, %c0_65, %c0_66] : memref<2x8x64xf32, #tpu.memory_space<vmem>>, vector<1x8x32xf32>
      %90 = vector.shape_cast %89 : vector<1x8x32xf32> to vector<8x32xf32>
      %91 = vector.shape_cast %85 : vector<8x32xf32> to vector<1x8x32xf32>
      tpu.vector_store %arg10[%c1_64, %c0_65, %c0_66], %91 {strides = array<i32>} : memref<2x8x64xf32, #tpu.memory_space<vmem>>, vector<1x8x32xf32>,
      scf.yield %56 : vector<8x128xf32>
    }
    %c8_i32_19 = arith.constant 8 : i32
    %c1 = arith.constant 1 : index
    %c0_20 = arith.constant 0 : index
    %c0_21 = arith.constant 0 : index
    %17 = vector.load %arg10[%c1, %c0_20, %c0_21] : memref<2x8x64xf32, #tpu.memory_space<vmem>>, vector<1x8x32xf32>
    %18 = vector.shape_cast %17 : vector<1x8x32xf32> to vector<8x32xf32>
    %c0_22 = arith.constant 0 : index
    %c0_23 = arith.constant 0 : index
    %19 = vector.load %arg6[%c0_22, %c0_23] : memref<32x4xf32, #tpu.memory_space<vmem>>, vector<32x4xf32>
    %cst_24 = arith.constant dense<0.000000e+00> : vector<8x4xf32>
    %20 = tpu.matmul %18, %19, %cst_24 {dimension_numbers = #tpu.dot_dimension_numbers<[1], [0], [0], [1], [0, 0, 1, 1], [], []>} : vector<8x32xf32>, vector<32x4xf32>, vector<8x4xf32> -> vector<8x4xf32>
    %c0_25 = arith.constant 0 : index
    %c0_26 = arith.constant 0 : index
    %21 = vector.load %arg7[%c0_25, %c0_26] : memref<1x4xf32, #tpu.memory_space<vmem>>, vector<1x4xf32>
    %22 = vector.broadcast %21 : vector<1x4xf32> to vector<8x4xf32>
    %23 = arith.addf %20, %22 : vector<8x4xf32>
    %c0_27 = arith.constant 0 : index
    %c0_28 = arith.constant 0 : index
    %24 = vector.load %arg8[%c0_27, %c0_28] : memref<8x4xf32, #tpu.memory_space<vmem>>, vector<8x4xf32>
    tpu.vector_store %arg8[%c0_27, %c0_28], %23 {strides = array<i32>} : memref<8x4xf32, #tpu.memory_space<vmem>>, vector<8x4xf32>,
    return
  }
  func.func @transform_0(%arg0: i32) -> (i32, i32, i32) {
    %c0_i32 = arith.constant 0 : i32
    %c0_i32_0 = arith.constant 0 : i32
    %c0_i32_1 = arith.constant 0 : i32
    return %c0_i32, %arg0, %c0_i32_0 : i32, i32, i32
  }
  func.func @transform_1(%arg0: i32) -> (i32, i32) {
    %c0_i32 = arith.constant 0 : i32
    %c0_i32_0 = arith.constant 0 : i32
    %c0_i32_1 = arith.constant 0 : i32
    return %c0_i32, %c0_i32_0 : i32, i32
  }
  func.func @transform_2(%arg0: i32) -> (i32, i32) {
    %c0_i32 = arith.constant 0 : i32
    %c0_i32_0 = arith.constant 0 : i32
    %c0_i32_1 = arith.constant 0 : i32
    return %c0_i32, %c0_i32_0 : i32, i32
  }
  func.func @transform_3(%arg0: i32) -> (i32, i32, i32) {
    %c0_i32 = arith.constant 0 : i32
    %c0_i32_0 = arith.constant 0 : i32
    %c0_i32_1 = arith.constant 0 : i32
    %c0_i32_2 = arith.constant 0 : i32
    return %c0_i32, %c0_i32_0, %c0_i32_1 : i32, i32, i32
  }
  func.func @transform_4(%arg0: i32) -> (i32, i32, i32) {
    %c0_i32 = arith.constant 0 : i32
    %c0_i32_0 = arith.constant 0 : i32
    %c0_i32_1 = arith.constant 0 : i32
    %c0_i32_2 = arith.constant 0 : i32
    return %c0_i32, %c0_i32_0, %c0_i32_1 : i32, i32, i32
  }
  func.func @transform_5(%arg0: i32) -> (i32, i32) {
    %c0_i32 = arith.constant 0 : i32
    %c0_i32_0 = arith.constant 0 : i32
    %c0_i32_1 = arith.constant 0 : i32
    return %c0_i32, %c0_i32_0 : i32, i32
  }
  func.func @transform_6(%arg0: i32) -> (i32, i32) {
    %c0_i32 = arith.constant 0 : i32
    %c0_i32_0 = arith.constant 0 : i32
    %c0_i32_1 = arith.constant 0 : i32
    return %c0_i32, %c0_i32_0 : i32, i32
  }
  func.func @transform_7(%arg0: i32) -> (i32, i32) {
    %c0_i32 = arith.constant 0 : i32
    %c0_i32_0 = arith.constant 0 : i32
    return %arg0, %c0_i32 : i32, i32
  }
}

</mosaic_0001>

<bundles_post_ra>
// kernel: tpu_custom_call.1
= control target key start
LH: loop header
LB: loop body
LE: loop exit
PB: predicated region body
PF: predicated region fallthrough
CT: control target
= control target key end

     0   :  { %12 = vsyncpa [#allocation6], 0  ;;  %s1042_s0 = inlined_call_operand.hbm [shape: f32[8,8,16], index: 0, kind: input, shape index: {}]   ;;  %s1043_s1 = inlined_call_operand.hbm [shape: f32[16,128], index: 1, kind: input, shape index: {}]   ;;  %s1044_s2 = inlined_call_operand.vmem [shape: f32[32,128], index: 2, kind: input, shape index: {}]   ;;  %s1045_s3 = inlined_call_operand.hbm [shape: f32[1,64,128], index: 3, kind: input, shape index: {}]   ;;  %s1046_s4 = inlined_call_operand.vmem [shape: f32[2,1,128], index: 4, kind: input, shape index: {}]   ;;  %s1047_s5 = inlined_call_operand.vmem [shape: f32[32,4], index: 5, kind: input, shape index: {}]   ;;  %s1048_s6 = inlined_call_operand.vmem [shape: f32[1,4], index: 6, kind: input, shape index: {}]   ;;  %s1049_s7 = inlined_call_operand.vmem [shape: f32[8,4], index: 7, kind: output, shape index: {}]  }
   0x1   :  { %13 = vsyncpa [#allocation8], 0  ;;  %s848_s24 = smov [#allocation7]   ;;  %s849_s26 = smov [#allocation5]  }
   0x2   :  { %s31_s25 = sshll.u32 %s848_s24, 4  ;;  %s19_s27 = sshll.u32 %s849_s26, 4  ;;  %s32_s25 = int_to_ptr.vmem [resolvable:$true] %s31_s25  ;;  %s902_s27 = int_to_ptr.vmem [resolvable:$true] %s19_s27 }
   0x3   :  { %s762_s30 = scalar_lea.hbm %s1043_s1, 256 }
   0x4   :  { %p763_p0 = scmp.ne.s32.totalorder %s1043_s1, %s762_s30  ;;  %p766_p1 = scmp.lt.u32.totalorder %s762_s30, %s1043_s1 }
   0x6   :  { %p768_p2 = pnand %p766_p1, %p763_p0 }
   0x8   :  { %771 = shalt.err (!%p768_p2)
}
   0x9   :  { %s772_s12 = scalar_lea.vmem %s32_s25, 256  ;;  %p777_p4 = scmp.lt.s32.totalorder %s32_s25, %s32_s25 }
   0xa   :  { %p773_p3 = scmp.ne.s32.totalorder %s32_s25, %s772_s12  ;;  %p778_p5 = scmp.lt.s32.totalorder %s772_s12, %s772_s12 }
   0xc   :  { %p779_p6 = por %p778_p5, %p777_p4 }
   0xe   :  { %p780_p7 = pnand %p779_p6, %p773_p3 }
  0x10   :  { %783 = shalt.err (!%p780_p7)
}
  0x11   :  { %s850_s13 = smov 128   ;;  %s851_s14 = smov 8  }
  0x12   :  { %37 = dma.hbm_to_vmem [thread:$0]  %s1043_s1, 256, %s32_s25, [#allocation8], %s850_s13, %s850_s13, %s851_s14  }
  0x13   :  { %s784_s19 = scalar_lea.hbm %s1042_s0, 1024 }
  0x14   :  { %p785_p8 = scmp.ne.s32.totalorder %s1042_s0, %s784_s19  ;;  %p788_p9 = scmp.lt.u32.totalorder %s784_s19, %s1042_s0 }
  0x16   :  { %p790_p10 = pnand %p788_p9, %p785_p8 }
  0x18   :  { %793 = shalt.err (!%p790_p10)
}
  0x19   :  { %s794_s24 = scalar_lea.vmem %s902_s27, 1024  ;;  %p799_p12 = scmp.lt.s32.totalorder %s902_s27, %s902_s27 }
  0x1a   :  { %p795_p11 = scmp.ne.s32.totalorder %s902_s27, %s794_s24  ;;  %p800_p13 = scmp.lt.s32.totalorder %s794_s24, %s794_s24 }
  0x1c   :  { %p801_p0 = por %p800_p13, %p799_p12 }
  0x1e   :  { %p802_p1 = pnand %p801_p0, %p795_p11 }
  0x20   :  { %805 = shalt.err (!%p802_p1)
}
  0x21   :  { %25 = dma.hbm_to_vmem [thread:$0]  %s1042_s0, 1024, %s902_s27, [#allocation6], %s850_s13, %s850_s13, %s851_s14  }
  0x22   :  { %s852_s26 = smov [#allocation9]   ;;  %s806_s8 = scalar_lea.hbm %s1045_s3, 1024 }
  0x23   :  { %s45_s28 = sshll.u32 %s852_s26, 4  ;;  %p807_p2 = scmp.ne.s32.totalorder %s1045_s3, %s806_s8  ;;  %s46_s28 = int_to_ptr.vmem [resolvable:$true] %s45_s28 }
  0x24   :  { %p810_p3 = scmp.lt.u32.totalorder %s806_s8, %s1045_s3 }
  0x26   :  { %p812_p4 = pnand %p810_p3, %p807_p2 }
  0x28   :  { %815 = shalt.err (!%p812_p4)
}
  0x29   :  { %s816_s15 = scalar_lea.vmem %s46_s28, 1024  ;;  %p821_p6 = scmp.lt.s32.totalorder %s46_s28, %s46_s28 }
  0x2a   :  { %p817_p5 = scmp.ne.s32.totalorder %s46_s28, %s816_s15  ;;  %p822_p7 = scmp.lt.s32.totalorder %s816_s15, %s816_s15 }
  0x2c   :  { %p823_p8 = por %p822_p7, %p821_p6 }
  0x2e   :  { %p824_p9 = pnand %p823_p8, %p817_p5 }
  0x30   :  { %827 = shalt.err (!%p824_p9)
}
  0x31   :  { %51 = dma.hbm_to_vmem [thread:$0]  %s1045_s3, 1024, %s46_s28, [#allocation8], %s850_s13, %s850_s13, %s851_s14  }
  0x32   :  { %836 = dma.done.wait [#allocation6], 1024  }
  0x33   :  { %837 = vsyncadd [#allocation6], 4294966272 }
  0x34   :  { %838 = dma.done.wait [#allocation8], 1280  }
  0x35   :  { %839 = vsyncadd [#allocation8], 4294966016  ;;  %vm222_vm0 = vcmask 523264   ;;  %vm225_vm1 = vcmask 261120   ;;  %v853_v0 = vmov 0.0   ;;  %vm84_vm2 = vcmask 130048  }
  0x36   :  { %224 = vst.msk [vmem:[#allocation3 + $0x8] sm:$0xff] %vm222_vm0, %v853_v0  ;;  %v75_v1 = vld [vmem:[#allocation7] sm:$0xff]  ;;  %v76_v2 = vld [vmem:[#allocation7 + $0x8] sm:$0xff]  ;;  %v69_v8 = vld [vmem:[#allocation5 + $0x10] sm:$0xff]  ;;  %v971_v29 = vmov 0.0   ;;  %s973_s14 = smov 0  }
  0x37   :  { %226 = vst.msk [vmem:[#allocation4] sm:$0xff] %vm225_vm1, %v853_v0  ;;  %227 = vst.msk [vmem:[#allocation4 + $0x8] sm:$0xff] %vm225_vm1, %v853_v0  ;;  %v67_v3 = vld [vmem:[#allocation5] sm:$0xff]  ;;  %v690_v4 = vpack.c.bf16 %v76_v2, %v75_v1  ;;  %v68_v6 = vld [vmem:[#allocation5 + $0x8] sm:$0xff] }
  0x38   :  { %637 = vmatprep.mubr.msk.f32.mxu0 %vm84_vm2, %v67_v3  ;;  %v71_v5 = vld [vmem:[#allocation5 + $0x20] sm:$0xff]  ;;  %v72_v7 = vld [vmem:[#allocation5 + $0x28] sm:$0xff]  ;;  %v73_v9 = vld [vmem:[#allocation5 + $0x30] sm:$0xff] }
  0x39   :  { %643 = vmatprep.mubr.msk.f32.mxu1 %vm84_vm2, %v71_v5  ;;  %691 = vmatprep.subr.bf16.mxu0 %v690_v4  ;;  %v70_v10 = vld [vmem:[#allocation5 + $0x18] sm:$0xff]  ;;  %v588_v12 = vld [vmem:[%s1046_s4] ss:$0 sm:$0xff] }
  0x3a   :  { %718 = vmatprep.subr.bf16.mxu1 %v690_v4  ;;  %693 = vmatpush3.bf16.msra.mxu0 %v690_v4  ;;  %v74_v11 = vld [vmem:[#allocation5 + $0x38] sm:$0xff] }
  0x3b   :  { %719 = vmatpush3.bf16.msra.mxu1 %v690_v4 }
  0x3d   :  { %638 = vmatmul.mubr.msk.f32.vlgmr.msra.gmra.mrb[0].mxu0 %vm84_vm2, %v68_v6 }
  0x3e   :  { %644 = vmatmul.mubr.msk.f32.vlgmr.msra.gmra.mrb[0].mxu1 %vm84_vm2, %v72_v7  ;;  %640 = vmatprep.mubr.msk.f32.mxu0 %vm84_vm2, %v69_v8 }
  0x3f   :  { %646 = vmatprep.mubr.msk.f32.mxu1 %vm84_vm2, %v73_v9 }
  0x41   :  { %641 = vmatmul.mubr.msk.f32.gmra.mrb[2].mxu0 %vm84_vm2, %v70_v10 }
  0x42   :  { %647 = vmatmul.mubr.msk.f32.gmra.mrb[2].mxu1 %vm84_vm2, %v74_v11 }
 0x110   :  { %v639_v13 = vpop.f32.mrb[0].mxu0 }
 0x111   :  { %v645_v14 = vpop.f32.mrb[0].mxu1  ;;  %v181_v15 = vadd.f32 %v639_v13, %v588_v12  ;;  %v175_v17 = vpop.f32.mrb[1].mxu0 }
 0x112   :  { %v201_v16 = vadd.f32 %v645_v14, %v588_v12  ;;  %v195_v18 = vpop.f32.mrb[1].mxu1  ;;  %v176_v19 = vadd.f32 %v588_v12, %v175_v17 }
 0x113   :  { %v196_v20 = vadd.f32 %v588_v12, %v195_v18  ;;  %215 = vst [vmem:[#allocation2 + $0x8] sm:$0xff] %v181_v15 }
 0x114   :  { %219 = vst [vmem:[#allocation2 + $0x28] sm:$0xff] %v201_v16  ;;  %214 = vst [vmem:[#allocation2] sm:$0xff] %v176_v19  ;;  %v642_v21 = vpop.f32.mrb[2].mxu0 }
 0x115   :  { %218 = vst [vmem:[#allocation2 + $0x20] sm:$0xff] %v196_v20  ;;  %v648_v22 = vpop.f32.mrb[2].mxu1  ;;  %v191_v23 = vadd.f32 %v642_v21, %v588_v12  ;;  %v185_v25 = vpop.f32.mrb[3].mxu0 }
 0x116   :  { %v211_v24 = vadd.f32 %v648_v22, %v588_v12  ;;  %v205_v26 = vpop.f32.mrb[3].mxu1  ;;  %v186_v27 = vadd.f32 %v588_v12, %v185_v25 }
 0x117   :  { %v206_v28 = vadd.f32 %v588_v12, %v205_v26  ;;  %217 = vst [vmem:[#allocation2 + $0x18] sm:$0xff] %v191_v23 }
 0x118   :  { %221 = vst [vmem:[#allocation2 + $0x38] sm:$0xff] %v211_v24  ;;  %216 = vst [vmem:[#allocation2 + $0x10] sm:$0xff] %v186_v27 }
 0x119   :  { %220 = vst [vmem:[#allocation2 + $0x30] sm:$0xff] %v206_v28 }
 0x11a LB: > { %s597_s16 = sshll.u32 %s846_s14, 3  ;;  %s854_s18 = smov 32   ;;  %v244_v33 = vld [vmem:[#allocation4] sm:$0xff]  ;;  %v278_v44 = vld [vmem:[%s1044_s2] sm:$0xff]  ;;  %v279_v45 = vld [vmem:[%s1044_s2 + $0x8] sm:$0xff]  ;;  %v855_v47 = vmov 0.0|0.0   ;;  %s846_s14 = sphi %s973_s14, %s233_s14   ;;  %v842_v29 = vphi %v971_v29, %v352_v29  }
 0x11b   : > { %s236_s17 = scalar_lea.vmem [#allocation2], %s597_s16  ;;  %v357_v46 = vld [vmem:[#allocation9] sm:$0xff]  ;;  %694 = vmatprep.subr.bf16.mxu0 %v855_v47  ;;  %700 = vmatprep.subr.bf16.mxu1 %v855_v47  ;;  %v695_v48 = vpack.c.bf16 %v279_v45, %v278_v44  ;;  %v358_v49 = vld [vmem:[#allocation9 + $0x8] sm:$0xff]  ;;  %v359_v53 = vld [vmem:[#allocation9 + $0x10] sm:$0xff]  ;;  %vm856_vm3 = vmmov 0   ;;  %v857_v55 = vmov 0.0  }
 0x11c   : > { %v280_v50 = vld [vmem:[%s1044_s2 + $0x10] sm:$0xff]  ;;  %v281_v51 = vld [vmem:[%s1044_s2 + $0x18] sm:$0xff]  ;;  %v701_v52 = vpack.c.bf16 %v358_v49, %v357_v46  ;;  %v360_v54 = vld [vmem:[#allocation9 + $0x18] sm:$0xff]  ;;  %657 = vmatprep.mubr.msk.f32.mxu0 %vm856_vm3, %v857_v55  ;;  %676 = vmatprep.mubr.msk.f32.mxu1 %vm856_vm3, %v857_v55  ;;  %s858_s26 = smov 64   ;;  %s859_s28 = smov 96   ;;  %vm276_vm4 = vcmask 523520  }
 0x11d   : > { %696 = vmatpush3.bf16.msra.mxu0 %v695_v48  ;;  %v698_v56 = vpack.c.bf16 %v281_v51, %v280_v50  ;;  %v704_v57 = vpack.c.bf16 %v360_v54, %v359_v53  ;;  %v361_v59 = vld [vmem:[#allocation9 + $0x20] sm:$0xff]  ;;  %v362_v60 = vld [vmem:[#allocation9 + $0x28] sm:$0xff]  ;;  %v363_v62 = vld [vmem:[#allocation9 + $0x30] sm:$0xff]  ;;  %s233_s14 = sadd.s32 1, %s846_s14  }
 0x11e   : > { %702 = vmatpush3.bf16.msra.mxu1 %v701_v52  ;;  %697 = vmatprep.subr.bf16.mxu0 %v855_v47  ;;  %v707_v61 = vpack.c.bf16 %v362_v60, %v361_v59  ;;  %v364_v63 = vld [vmem:[#allocation9 + $0x38] sm:$0xff]  ;;  %v452_v4 = vld [vmem:[#allocation4 + $0x8] sm:$0xff]  ;;  %v600_v9 = vld [vmem:[%s1046_s4 + $0x1] ss:$0 sm:$0xff]  ;;  %p230_p10 = scmp.ge.s32.totalorder %s233_s14, 8  }
 0x11f   : > { %703 = vmatprep.subr.bf16.mxu1 %v855_v47  ;;  %v710_v1 = vpack.c.bf16 %v364_v63, %v363_v62  ;;  %vm861_vm5 = vmmov (%p230_p10), 0   ;;  %vm570_vm6 = vcmask (%p230_p10), 31744  }
 0x120   : > { %v237_v30 = vld [vmem:[%s236_s17] sm:$0xff] }
 0x121   : > { %v238_v31 = vadd.f32 %v842_v29, %v237_v30  ;;  %699 = vmatpush3.bf16.msra.mxu0 %v698_v56 }
 0x122   : > { %705 = vmatpush3.bf16.msra.mxu1 %v704_v57 }
 0x123   : > { %750 = vtanh.f32 %v238_v31  ;;  %v239_v34 = vmul.f32 0.5, %v238_v31  ;;  %706 = vmatprep.subr.bf16.mxu1 %v855_v47  ;;  %v486_v31 = vld [vmem:[%s1047_s5] sm:$0xff] (%p230_p10) }
 0x125   : > { %752 = vtanh.f32 %v239_v34  ;;  %v860_v34 = vmov (%p230_p10), 0.0|0.0  }
 0x126   : > { %708 = vmatpush3.bf16.msra.mxu1 %v707_v61  ;;  %712 = vmatprep.subr.bf16.mxu0 (%p230_p10), %v860_v34 }
 0x127   : > { %709 = vmatprep.subr.bf16.mxu1 %v855_v47 }
 0x12a   : > { %711 = vmatpush3.bf16.msra.mxu1 %v710_v1 }
 0x12d   : > { %v751_v32 = vpop.eup %750 }
 0x12e   : > { %251 = vrot.lane.b32.xlu0 %v751_v32, %s854_s18  ;;  %v487_v32 = vld [vmem:[%s1047_s5 + $0x8] sm:$0xff] (%p230_p10) }
 0x12f   : > { %v753_v35 = vpop.eup %752 }
 0x130   : > { %v241_v36 = vmul.f32 0.5, %v753_v35  ;;  %v713_v35 = vpack.c.bf16 (%p230_p10), %v487_v32, %v486_v31 }
 0x132   : > { %246 = vrot.lane.b32.xlu0 %v244_v33, %s854_s18  ;;  %v242_v37 = vadd.f32 0.5, %v241_v36  ;;  %v488_v33 = vld [vmem:[%s1047_s5 + $0x10] sm:$0xff] (%p230_p10) }
 0x1a0   : > { %v252_v38 = vpop.permute.xlu0 %251 }
 0x1a1   : > { %v254_v39 = vmul.f32 %v252_v38, %v242_v37  ;;  %v602_v38 = vld [vmem:[%s1048_s6] ss:$0 sm:$0xff] (%p230_p10) }
 0x1a3   : > { %256 = vrot.lane.b32.xlu1 %v254_v39, %s854_s18 }
 0x1a4   : > { %v247_v40 = vpop.permute.xlu0 %246 }
 0x1a5   : > { %v249_v41 = vmul.f32 %v247_v40, %v242_v37 }
 0x215   : > { %v257_v42 = vpop.permute.xlu1 %256 }
 0x216   : > { %v983_v43 = vadd.f32 %v257_v42, %v249_v41 }
 0x218   : > { %754 = vtanh.f32 %v983_v43 }
 0x222   : > { %v755_v58 = vpop.eup %754 }
 0x223   : > { %262 = vrot.lane.b32.xlu1 %v755_v58, %s854_s18 }
 0x295   : > { %v263_v2 = vpop.permute.xlu1 %262 }
 0x296   : > { %v265_v3 = vmul.f32 %v263_v2, %v242_v37 }
 0x298   : > { %282 = vrot.lane.b32.xlu1 %v265_v3, %s858_s26  ;;  %272 = vrot.lane.b32.xlu0 %v265_v3, %s859_s28 }
 0x29c   : > { %454 = vrot.lane.b32.xlu1 %v452_v4, %s854_s18 }
 0x30a   : > { %v283_v5 = vpop.permute.xlu1 %282  ;;  %v273_v6 = vpop.permute.xlu0 %272 }
 0x30b   : > { %277 = vst.msk [vmem:[#allocation3 + $0x8] sm:$0xff] %vm276_vm4, %v273_v6  ;;  %658 = vmatmul.mubr.msk.f32.vlgmr.msra.gmra.mrb[0].mxu0 %vm225_vm1, %v283_v5 }
 0x30c   :  { %687 = vmatprep.mubr.msk.f32.mxu0 (%p230_p10), %vm861_vm5, %v853_v0  ;;  %714 = vmatpush3.bf16.msra.mxu0 (%p230_p10), %v713_v35 }
 0x30d   :  { %715 = vmatprep.subr.bf16.mxu0 (%p230_p10), %v860_v34 }
 0x30e   : > { %v455_v20 = vpop.permute.xlu1 %454 }
 0x312   : > { %v356_v7 = vld [vmem:[#allocation3 + $0x8] sm:$0xff] }
 0x313   : > { %677 = vmatmul.mubr.msk.f32.vlgmr.msra.gmra.mrb[0].mxu1 %vm222_vm0, %v356_v7 }
 0x3de   : > { %v352_v29 = vpop.f32.mrb[0].mxu0  }
 0x3df   : > { %v659_v8 = vpop.f32.mrb[1].mxu0  ;;  %v489_v29 = vld [vmem:[%s1047_s5 + $0x18] sm:$0xff] (%p230_p10) }
 0x3e0   :  { %v716_v36 = vpack.c.bf16 (%p230_p10), %v489_v29, %v488_v33 }
 0x3e2   :  { %717 = vmatpush3.bf16.msra.mxu0 (%p230_p10), %v716_v36 }
 0x3e6   : > { %v442_v10 = vpop.f32.mrb[0].mxu1 }
 0x3e7   : > { %v443_v11 = vadd.f32 %v600_v9, %v442_v10  ;;  %v678_v12 = vpop.f32.mrb[1].mxu1 }
 0x3e9   : > { %756 = vtanh.f32 %v443_v11  ;;  %v446_v14 = vmul.f32 0.5, %v443_v11 }
 0x3eb   : > { %758 = vtanh.f32 %v446_v14 }
 0x3f3   : > { %v757_v13 = vpop.eup %756 }
 0x3f4   : > { %459 = vrot.lane.b32.xlu0 %v757_v13, %s854_s18 }
 0x3f5   : > { %v759_v15 = vpop.eup %758 }
 0x3f6   : > { %v448_v16 = vmul.f32 0.5, %v759_v15 }
 0x3f8   : > { %v449_v17 = vadd.f32 0.5, %v448_v16 }
 0x3fa   : > { %v457_v21 = vmul.f32 %v455_v20, %v449_v17 }
 0x466   : > { %v460_v18 = vpop.permute.xlu0 %459 }
 0x467   : > { %v462_v19 = vmul.f32 %v460_v18, %v449_v17 }
 0x469   : > { %464 = vrot.lane.b32.xlu0 %v462_v19, %s854_s18 }
 0x46d   : > { %267 = vrot.lane.b32.xlu0 %v983_v43, %s859_s28 }
 0x4db   : > { %v465_v22 = vpop.permute.xlu0 %464 }
 0x4dc   : > { %v467_v23 = vadd.f32 %v465_v22, %v457_v21 }
 0x4de   : > { %760 = vtanh.f32 %v467_v23 }
 0x4df   : > { %v268_v24 = vpop.permute.xlu0 %267 }
 0x4e0   : > { %270 = vst.msk [vmem:[#allocation4] sm:$0xff] %vm225_vm1, %v268_v24 }
 0x4e8   : > { %v761_v25 = vpop.eup %760 }
 0x4e9   : > { %470 = vrot.lane.b32.xlu1 %v761_v25, %s854_s18 }
 0x4ed   : > { %475 = vrot.lane.b32.xlu1 %v467_v23, %s859_s28 }
 0x55b   : > { %v471_v26 = vpop.permute.xlu1 %470 }
 0x55c   : > { %v473_v27 = vmul.f32 %v471_v26, %v449_v17 }
 0x55e   : > { %480 = vrot.lane.b32.xlu0 %v473_v27, %s858_s26 }
 0x55f   : > { %v476_v28 = vpop.permute.xlu1 %475 }
 0x560   : > { %478 = vst.msk [vmem:[#allocation4 + $0x8] sm:$0xff] %vm225_vm1, %v476_v28 }
 0x5cb   :  { %232 = sbr.rel (!%p230_p10) target bundleno = 282 (0x11a), region = 72 }
 0x5d0   : > { %v481_v30 = vpop.permute.xlu0 %480 }
 0x5d1   : > { %483 = vst.msk [vmem:[#allocation3 + $0x8] sm:$0xff] %vm225_vm1, %v481_v30 }
 0x5d8   :  { %v485_v37 = vld [vmem:[#allocation3 + $0x8] sm:$0xff] }
 0x5d9   :  { %688 = vmatmul.mubr.msk.f32.vlgmr.msra.gmra.mrb[0].mxu0 %vm225_vm1, %v485_v37 }
 0x6ac   :  { %v566_v39 = vpop.f32.mrb[0].mxu0 }
 0x6ad   :  { %v567_v40 = vadd.f32 %v602_v38, %v566_v39  ;;  %v689_v41 = vpop.f32.mrb[1].mxu0 }
 0x6af   :  { %571 = vst.msk [vmem:[%s1049_s7] sm:$0xff] %vm570_vm6, %v567_v40 }
 0x6b0   :  { %576 = vsyncpa [#allocation6], 1 }
 0x6b1   :  { %577 = vsyncpa [#allocation8], 1 }

</bundles_post_ra>
